<compile_context>
chip_gen: v7x
topology: tpu7x:2x2x1
jax: 0.10.0
libtpu: 0.0.40
codegen_flags: <defaults>
</compile_context>

<pallas_src>
import functools

import jax
import jax.numpy as jnp
from jax.experimental import pallas as pl
from jax.experimental.pallas import tpu as pltpu

IN, HID, OUT = 5, 16, 3
_LANE = 128
_TB_MAX = 65536          # ~1.4 MB of HBM I/O per grid step, ~10 MiB VMEM working set


def _round_up(n, m):
    return ((n + m - 1) // m) * m


def _choose_tb(batch):
    """Pick a lane tile: as large as possible (<= _TB_MAX) while keeping >= 4
    grid steps when the batch allows it (v7x 2-TC split + pipeline overlap)."""
    b_min = _round_up(batch, _LANE)
    steps = max(1, min(4, b_min // _LANE))
    tb = _round_up(pl.cdiv(b_min, steps), _LANE)
    return min(tb, _TB_MAX)


# ----------------------------------------------------------------------------
# Kernel: feature-major, lane-dense.  x (5, TB) bf16, out (OUT, TB).
# H = relu(W1 @ X + b1) ; O = W2 @ H + b2, with f32 accumulation on the MXU.
# ----------------------------------------------------------------------------
def poker_kernel(x_ref, w1_ref, b1_ref, w2_ref, b2_ref, o_ref):
    x = x_ref[...]                                                   # (5, TB) bf16
    h = jnp.dot(w1_ref[...], x, preferred_element_type=jnp.float32)  # (16, TB) f32
    h = jnp.maximum(h + b1_ref[...], 0.0)                            # bias (16,1) bcast
    h = h.astype(jnp.bfloat16)
    o = jnp.dot(w2_ref[...], h, preferred_element_type=jnp.float32)  # (3, TB) f32
    o_ref[...] = (o + b2_ref[...]).astype(o_ref.dtype)


@functools.partial(jax.jit, static_argnames=("tb", "out_dtype"))
def _poker_pallas(x_fm_bf16, w1, b1, w2, b2, *, tb, out_dtype):
    """x_fm_bf16: (IN, B_pad) bf16 with B_pad % tb == 0."""
    b_pad = x_fm_bf16.shape[1]
    grid = (b_pad // tb,)
    return pl.pallas_call(
        poker_kernel,
        out_shape=jax.ShapeDtypeStruct((OUT, b_pad), out_dtype),
        grid=grid,
        in_specs=[
            pl.BlockSpec((IN, tb), lambda i: (0, i)),     # x: streamed over batch
            pl.BlockSpec((HID, IN), lambda i: (0, 0)),    # W1: VMEM-resident
            pl.BlockSpec((HID, 1), lambda i: (0, 0)),     # b1: VMEM-resident
            pl.BlockSpec((OUT, HID), lambda i: (0, 0)),   # W2: VMEM-resident
            pl.BlockSpec((OUT, 1), lambda i: (0, 0)),     # b2: VMEM-resident
        ],
        out_specs=pl.BlockSpec((OUT, tb), lambda i: (0, i)),  # lane-dense output
        compiler_params=pltpu.CompilerParams(
            dimension_semantics=("parallel",),        # v7x 2-TC split; no-op on 1-TC chips
            vmem_limit_bytes=32 * 1024 * 1024,        # raise v5e's 16 MiB default
        ),
    )(x_fm_bf16, w1, b1, w2, b2)


# ----------------------------------------------------------------------------
# Parameter handling (PyTorch layout in, kernel layout out -- one-time cost).
# ----------------------------------------------------------------------------
def init_params(key):
    """PyTorch nn.Linear-style init: w (out,in) f32, b (out,) f32."""
    k1, k2, k3, k4 = jax.random.split(key, 4)
    lim1 = 1.0 / jnp.sqrt(IN)
    lim2 = 1.0 / jnp.sqrt(HID)
    w1 = jax.random.uniform(k1, (HID, IN), jnp.float32, -lim1, lim1)
    b1 = jax.random.uniform(k2, (HID,), jnp.float32, -lim1, lim1)
    w2 = jax.random.uniform(k3, (OUT, HID), jnp.float32, -lim2, lim2)
    b2 = jax.random.uniform(k4, (OUT,), jnp.float32, -lim2, lim2)
    return w1, b1, w2, b2


def prepare_params(w1, b1, w2, b2):
    """One-time conversion to kernel layout: bf16 weights, f32 column biases."""
    return (w1.astype(jnp.bfloat16),
            b1.reshape(HID, 1).astype(jnp.float32),
            w2.astype(jnp.bfloat16),
            b2.reshape(OUT, 1).astype(jnp.float32))


# ----------------------------------------------------------------------------
# Forward passes.
# ----------------------------------------------------------------------------
def _xla_forward_fm(x_fm, params):
    """Plain-XLA path (tiny batches).  Numerics mirror the kernel path."""
    w1, b1, w2, b2 = params
    xb = x_fm.astype(jnp.bfloat16)
    h = jnp.maximum(jnp.dot(w1, xb, preferred_element_type=jnp.float32) + b1, 0.0)
    h = h.astype(jnp.bfloat16)
    return jnp.dot(w2, h, preferred_element_type=jnp.float32) + b2


def poker_nn_forward_fm(x_fm, params, *, out_dtype=jnp.float32):
    """Preferred entry point: feature-major x (IN, B) -> (OUT, B).
    Pass x already in bfloat16 (and consume bf16 output via out_dtype) to make
    the kernel the only HBM pass over the activations."""
    assert x_fm.shape[0] == IN
    batch = x_fm.shape[1]
    w1, b1, w2, b2 = params

    if batch <= _LANE:
        # Single-tile work: pallas_call launch overhead dominates; use XLA.
        return _xla_forward_fm(x_fm, params).astype(out_dtype)

    tb = _choose_tb(batch)
    b_pad = _round_up(batch, tb)
    x_bf = x_fm.astype(jnp.bfloat16)
    if b_pad != batch:
        x_bf = jnp.pad(x_bf, ((0, 0), (0, b_pad - batch)))
    out = _poker_pallas(x_bf, w1, b1, w2, b2, tb=tb, out_dtype=out_dtype)
    return out[:, :batch]


def poker_nn_forward(x, params, *, out_dtype=jnp.float32):
    """PyTorch-contract forward: x (B, IN) -> (B, OUT).
    NOTE: the two transposes here are strided HBM passes with minor dims 5/3;
    prefer poker_nn_forward_fm when producer/consumer can use feature-major."""
    batch = x.shape[0]
    if batch <= _LANE:
        return _xla_forward_fm(x.T, params).T.astype(out_dtype)
    return poker_nn_forward_fm(x.T, params, out_dtype=out_dtype).T


# ----------------------------------------------------------------------------
# Reference (high-precision f32 math, mirroring the kernel's bf16 roundings).
# ----------------------------------------------------------------------------
def _reference(x, w1, b1, w2, b2):
    hp = jax.lax.Precision.HIGHEST
    xb = x.astype(jnp.bfloat16).astype(jnp.float32)
    w1b = w1.astype(jnp.bfloat16).astype(jnp.float32)
    w2b = w2.astype(jnp.bfloat16).astype(jnp.float32)
    h = jnp.maximum(jnp.dot(xb, w1b.T, precision=hp) + b1, 0.0)
    hb = h.astype(jnp.bfloat16).astype(jnp.float32)
    return jnp.dot(hb, w2b.T, precision=hp) + b2


if __name__ == "__main__":
    key = jax.random.PRNGKey(0)
    kx1, kx2, kp = jax.random.split(key, 3)
    w1, b1, w2, b2 = init_params(kp)
    params = prepare_params(w1, b1, w2, b2)

    # 1) Tiny batch -> XLA bypass path (no Pallas launch overhead).
    B1 = 8
    x1 = jax.random.normal(kx1, (B1, IN), jnp.float32)
    out1 = jax.block_until_ready(poker_nn_forward(x1, params))
    assert out1.shape == (B1, OUT)
    assert jnp.allclose(out1, _reference(x1, w1, b1, w2, b2), atol=1e-4, rtol=1e-4)

    # 2) Feature-major Pallas path: non-multiple batch, 4-step pipelined grid.
    B2 = 2000
    x2_fm = jax.random.normal(kx2, (IN, B2), jnp.float32)
    out2_fm = jax.block_until_ready(poker_nn_forward_fm(x2_fm, params))
    assert out2_fm.shape == (OUT, B2)
    assert jnp.allclose(out2_fm.T, _reference(x2_fm.T, w1, b1, w2, b2),
                        atol=1e-4, rtol=1e-4)

    # 3) Batch-major compatibility wrapper over the same Pallas path.
    out2_bm = jax.block_until_ready(poker_nn_forward(x2_fm.T, params))
    assert out2_bm.shape == (B2, OUT)
    assert jnp.allclose(out2_bm, out2_fm.T, atol=1e-5, rtol=1e-5)

    print("KERNEL_OK")
</pallas_src>

<mosaic_0001>
module attributes {stable_mosaic.version = 11 : i64} {
  func.func @poker_kernel(%arg0: i32, %arg1: memref<5x512xbf16, #tpu.memory_space<vmem>>, %arg2: memref<16x5xbf16, #tpu.memory_space<vmem>>, %arg3: memref<16x1xf32, #tpu.memory_space<vmem>>, %arg4: memref<3x16xbf16, #tpu.memory_space<vmem>>, %arg5: memref<3x1xf32, #tpu.memory_space<vmem>>, %arg6: memref<3x512xf32, #tpu.memory_space<vmem>>) attributes {dimension_semantics = [#tpu.dimension_semantics<parallel>], iteration_bounds = array<i64: 4>, scalar_prefetch = 0 : i64, scratch_operands = 0 : i64, tpu.core_type = #tpu.core_type<tc>, window_params = [{transform_indices = @transform_0, window_bounds = array<i64: 5, 512>}, {pipeline_mode = #tpu.pipeline_mode<synchronous>, transform_indices = @transform_1, window_bounds = array<i64: 16, 5>}, {pipeline_mode = #tpu.pipeline_mode<synchronous>, transform_indices = @transform_2, window_bounds = array<i64: 16, 1>}, {pipeline_mode = #tpu.pipeline_mode<synchronous>, transform_indices = @transform_3, window_bounds = array<i64: 3, 16>}, {pipeline_mode = #tpu.pipeline_mode<synchronous>, transform_indices = @transform_4, window_bounds = array<i64: 3, 1>}, {transform_indices = @transform_5, window_bounds = array<i64: 3, 512>}]} {
    %c0 = arith.constant 0 : index
    %c0_0 = arith.constant 0 : index
    %0 = vector.load %arg1[%c0, %c0_0] : memref<5x512xbf16, #tpu.memory_space<vmem>>, vector<5x512xbf16>
    %c0_1 = arith.constant 0 : index
    %c0_2 = arith.constant 0 : index
    %1 = vector.load %arg2[%c0_1, %c0_2] : memref<16x5xbf16, #tpu.memory_space<vmem>>, vector<16x5xbf16>
    %cst = arith.constant dense<0.000000e+00> : vector<16x512xf32>
    %2 = tpu.matmul %1, %0, %cst {dimension_numbers = #tpu.dot_dimension_numbers<[1], [0], [0], [1], [0, 0, 1, 1], [], []>} : vector<16x5xbf16>, vector<5x512xbf16>, vector<16x512xf32> -> vector<16x512xf32>
    %c0_3 = arith.constant 0 : index
    %c0_4 = arith.constant 0 : index
    %3 = vector.load %arg3[%c0_3, %c0_4] : memref<16x1xf32, #tpu.memory_space<vmem>>, vector<16x1xf32>
    %4 = vector.broadcast %3 : vector<16x1xf32> to vector<16x512xf32>
    %5 = arith.addf %2, %4 : vector<16x512xf32>
    %cst_5 = arith.constant 0.000000e+00 : f32
    %6 = vector.broadcast %cst_5 : f32 to vector<16x512xf32>
    %7 = arith.maximumf %5, %6 : vector<16x512xf32>
    %8 = arith.truncf %7 : vector<16x512xf32> to vector<16x512xbf16>
    %c0_6 = arith.constant 0 : index
    %c0_7 = arith.constant 0 : index
    %9 = vector.load %arg4[%c0_6, %c0_7] : memref<3x16xbf16, #tpu.memory_space<vmem>>, vector<3x16xbf16>
    %cst_8 = arith.constant dense<0.000000e+00> : vector<3x512xf32>
    %10 = tpu.matmul %9, %8, %cst_8 {dimension_numbers = #tpu.dot_dimension_numbers<[1], [0], [0], [1], [0, 0, 1, 1], [], []>} : vector<3x16xbf16>, vector<16x512xbf16>, vector<3x512xf32> -> vector<3x512xf32>
    %c0_9 = arith.constant 0 : index
    %c0_10 = arith.constant 0 : index
    %11 = vector.load %arg5[%c0_9, %c0_10] : memref<3x1xf32, #tpu.memory_space<vmem>>, vector<3x1xf32>
    %12 = vector.broadcast %11 : vector<3x1xf32> to vector<3x512xf32>
    %13 = arith.addf %10, %12 : vector<3x512xf32>
    %c0_11 = arith.constant 0 : index
    %c0_12 = arith.constant 0 : index
    %14 = vector.load %arg6[%c0_11, %c0_12] : memref<3x512xf32, #tpu.memory_space<vmem>>, vector<3x512xf32>
    tpu.vector_store %arg6[%c0_11, %c0_12], %13 {strides = array<i32>} : memref<3x512xf32, #tpu.memory_space<vmem>>, vector<3x512xf32>,
    return
  }
  func.func @transform_0(%arg0: i32) -> (i32, i32) {
    %c0_i32 = arith.constant 0 : i32
    %c0_i32_0 = arith.constant 0 : i32
    return %c0_i32, %arg0 : i32, i32
  }
  func.func @transform_1(%arg0: i32) -> (i32, i32) {
    %c0_i32 = arith.constant 0 : i32
    %c0_i32_0 = arith.constant 0 : i32
    %c0_i32_1 = arith.constant 0 : i32
    return %c0_i32, %c0_i32_0 : i32, i32
  }
  func.func @transform_2(%arg0: i32) -> (i32, i32) {
    %c0_i32 = arith.constant 0 : i32
    %c0_i32_0 = arith.constant 0 : i32
    %c0_i32_1 = arith.constant 0 : i32
    return %c0_i32, %c0_i32_0 : i32, i32
  }
  func.func @transform_3(%arg0: i32) -> (i32, i32) {
    %c0_i32 = arith.constant 0 : i32
    %c0_i32_0 = arith.constant 0 : i32
    %c0_i32_1 = arith.constant 0 : i32
    return %c0_i32, %c0_i32_0 : i32, i32
  }
  func.func @transform_4(%arg0: i32) -> (i32, i32) {
    %c0_i32 = arith.constant 0 : i32
    %c0_i32_0 = arith.constant 0 : i32
    %c0_i32_1 = arith.constant 0 : i32
    return %c0_i32, %c0_i32_0 : i32, i32
  }
  func.func @transform_5(%arg0: i32) -> (i32, i32) {
    %c0_i32 = arith.constant 0 : i32
    %c0_i32_0 = arith.constant 0 : i32
    return %c0_i32, %arg0 : i32, i32
  }
}

</mosaic_0001>

<bundles_post_ra>
// kernel: _poker_pallas.1
= control target key start
LH: loop header
LB: loop body
LE: loop exit
PB: predicated region body
PF: predicated region fallthrough
CT: control target
= control target key end

     0   :  { %10 = vsyncpa [#allocation3], 0  ;;  %s971_s0 = inlined_call_operand.hbm [shape: bf16[5,2048], index: 0, kind: input, shape index: {}]   ;;  %s972_s1 = inlined_call_operand.vmem [shape: bf16[16,5], index: 1, kind: input, shape index: {}]   ;;  %s973_s2 = inlined_call_operand.vmem [shape: f32[16,1], index: 2, kind: input, shape index: {}]   ;;  %s974_s3 = inlined_call_operand.vmem [shape: bf16[3,16], index: 3, kind: input, shape index: {}]   ;;  %s975_s4 = inlined_call_operand.vmem [shape: f32[3,1], index: 4, kind: input, shape index: {}]   ;;  %s976_s5 = inlined_call_operand.hbm [shape: f32[3,2048], index: 5, kind: output, shape index: {}]  }
   0x1   :  { %12 = vsyncpa [#allocation3 + $0x1], 0 }
   0x2   :  { %13 = vsyncpa [#allocation4], 0 }
   0x3   :  { %15 = vsyncpa [#allocation4 + $0x1], 0  ;;  %s793_s18 = smov 0   ;;  %s795_s19 = smov 0  }
   0x4   :  { %s797_s20 = smov 0   ;;  %s799_s21 = smov 0  }
   0x5 LB: > { %s814_s22 = sadd.s32 4294967295, %s757_s21   ;;  %s581_s23 = sadd.s32 4294967294, %s757_s21   ;;  %s757_s21 = sphi %s799_s21, %s990_s21   ;;  %s753_s20 = sphi %s797_s20, %s989_s20   ;;  %s749_s19 = sphi %s795_s19, %s988_s19   ;;  %s745_s18 = sphi %s793_s18, %s987_s18  }
   0x6   : > { %s818_s24 = sadd.s32 1, %s757_s21   ;;  %s28_s25 = sadd.s32 1, %s753_s20 }
   0x7   : > { %s25_s26 = ssub.s32 %s757_s21, %s818_s24  ;;  %p35_p0 = scmp.ne.s32.totalorder %s753_s20, %s749_s19 }
   0x8   : > { %p26_p1 = scmp.eq.s32.totalorder %s25_s26, 0  ;;  %p36_p2 = scmp.eq.s32.totalorder %s757_s21, 0 }
   0x9   : > { %p41_p3 = scmp.ne.s32.totalorder %s749_s19, %s745_s18  ;;  %p42_p4 = scmp.eq.s32.totalorder %s814_s22, 0 }
   0xa   : > { %s830_s27 = scalar_select %p26_p1, %s753_s20, %s28_s25  }
   0xb   : > { %p832_p5 = por %p36_p2, %p35_p0  ;;  %p836_p6 = por %p42_p4, %p41_p3 }
   0xc   : > { %p149_p7 = scmp.eq.s32.totalorder %s814_s22, 3  ;;  %p155_p8 = scmp.eq.s32.totalorder %s581_s23, 3 }
   0xd   : > { %p618_p9 = scmp.lt.s32.totalorder %s757_s21, 4  ;;  %s187_s7 = sand.u32 1, %s753_s20  }
   0xe   : > { %p842_p10 = por %p149_p7, %p35_p0  ;;  %p846_p11 = por %p155_p8, %p41_p3 }
   0xf   : > { %s604_s8 = sshll.u32 %s757_s21, 8  ;;  %s584_s9 = sshll.u32 %s187_s7, 4 }
  0x10   : > { %s980_s30 = scalar_select %p842_p10, 1, 0 }
  0x11   : > { %s981_s6 = scalar_select %p846_p11, 1, 0 }
  0x12   : > { %s855_s12 = scalar_lea.hbm %s971_s0, %s604_s8  ;;  %s191_s13 = scalar_lea.vmem [#allocation2], %s584_s9 }
  0x13   : > { %s199_s14 = sshll.u32 %s191_s13, 4  ;;  %p859_p12 = pnand %p618_p9, %p832_p5  ;;  %s863_s14 = int_to_ptr.vmem [resolvable:$true] %s199_s14 }
  0x14   : > { %s188_s16 = scalar_lea.sflag [#allocation3], %s187_s7  ;;  %s661_s17 = scalar_lea.hbm %s855_s12, 256 }
  0x15   : > { %p662_p1 = scmp.ne.s32.totalorder %s855_s12, %s661_s17  ;;  %p663_p2 = pneg %p859_p12 }
  0x16   : > { %s666_s26 = scalar_lea.hbm %s971_s0, 1024  ;;  %p667_p5 = scmp.lt.u32.totalorder %s855_s12, %s971_s0 }
  0x17   : > { %p664_p3 = pnand %p663_p2, %p662_p1  ;;  %p668_p7 = scmp.lt.u32.totalorder %s666_s26, %s661_s17 }
  0x18   : > { %p670_p9 = scmp.lt.u32.totalorder %s661_s17, %s855_s12 }
  0x19   : > { %p665_p4 = pneg %p664_p3  ;;  %p669_p8 = por %p668_p7, %p667_p5 }
  0x1b   : > { %p671_p13 = por %p670_p9, %p669_p8 }
  0x1d   : > { %p672_p0 = pnand %p671_p13, %p665_p4 }
  0x1f   : > { %675 = shalt.err (!%p672_p0)
}
  0x20   : > { %s676_s7 = scalar_lea.vmem %s863_s14, 256  ;;  %s759_s9 = smov [#allocation2]  }
  0x21   : > { %p677_p1 = scmp.ne.s32.totalorder %s863_s14, %s676_s7  ;;  %s681_s10 = sshll.u32 %s759_s9, 4  ;;  %s682_s10 = int_to_ptr.vmem [resolvable:$false] %s681_s10 }
  0x22   : > { %s683_s11 = scalar_lea.vmem %s682_s10, 512  ;;  %p684_p10 = scmp.lt.s32.totalorder %s863_s14, %s682_s10 }
  0x23   : > { %p679_p3 = pnand %p677_p1, %p663_p2  ;;  %p685_p5 = scmp.lt.s32.totalorder %s683_s11, %s676_s7 }
  0x25   : > { %p680_p11 = pneg %p679_p3  ;;  %p686_p7 = por %p685_p5, %p684_p10 }
  0x27   : > { %p687_p8 = pnand %p686_p7, %p680_p11 }
  0x29   : > { %690 = shalt.err (!%p687_p8)
}
  0x2a   : > { %613 = dma.hbm_to_vmem [thread:$0]  (!%p859_p12), %s855_s12, 256, %s863_s14, %s188_s16  }
  0x2b   : > { %p983_p13 = scmp.lt.s32.totalorder %s757_s21, 5  ;;  %p984_p0 = scmp.ge.s32.totalorder %s757_s21, 1 }
  0x2d   : > { %p205_p2 = pnand %p984_p0, %p983_p13 }
  0x2e   : > { %s897_s13 = sand.u32 (!%p205_p2), 1, %s749_s19  }
  0x2f   : > { %208 = sbr.rel (%p205_p2) target bundleno = 521 (0x209), region = 40  ;;  %s588_s17 = sshll.u32 (!%p205_p2), %s897_s13, 4 }
  0x30   : > { %s211_s23 = scalar_lea.sflag (!%p205_p2), [#allocation3], %s897_s13  ;;  %s214_s15 = scalar_lea.vmem (!%p205_p2), [#allocation2], %s588_s17 }
  0x36   : > { %736 = dma.done.wait (%p836_p6), %s211_s23, 256  }
  0x37   : > { %738 = vsyncadd (%p836_p6), %s211_s23, 4294967040  ;;  %vm279_vm0 = vcmask 1041408   ;;  %v760_v0 = vmov 0   ;;  %vm280_vm1 = vcmask 1042432   ;;  %v761_v1 = vmov 65535   ;;  %v248_v10 = vld [vmem:[%s973_s2] sm:$0xff] }
  0x38   : > { %327 = vmatprep.mubr.bf16.mxu0 %v760_v0  ;;  %370 = vmatprep.mubr.bf16.mxu1 %v760_v0  ;;  %v281_v2 = vsel %vm279_vm0, 4294967295, %v761_v1  ;;  %v244_v4 = vld [vmem:[%s214_s15] sm:$0x77]  ;;  %v245_v5 = vld [vmem:[%s214_s15 + $0x8] sm:$0x77]  ;;  %vm275_vm2 = vcmask 39936  }
  0x39   : > { %654 = vset.pattern.permute.xlu0 %v760_v0  ;;  %655 = vset.pattern.permute.xlu1 %v760_v0  ;;  %v282_v3 = vsel %vm280_vm1, %v281_v2, 0  ;;  %v592_v6 = vcombine.high %v244_v4, %v244_v4  ;;  %v594_v7 = vcombine.high %v245_v5, %v245_v5  ;;  %v591_v8 = vcombine.low %v244_v4, %v244_v4  ;;  %v249_v15 = vld [vmem:[%s973_s2 + $0x8] sm:$0xff]  ;;  %v660_v16 = vld [vmem:[%s972_s1] sm:$0xff]   ;;  %s605_s10 = sshll.u32 %s814_s22, 8  ;;  %s240_s11 = scalar_lea.vmem [#allocation5], %s588_s17 }
  0x3a   : > { %v593_v9 = vcombine.low %v245_v5, %v245_v5  ;;  %252 = vperm.xlu0 %654, %v248_v10   ;;  %v394_v17 = vld [vmem:[%s975_s4] sm:$0x7]  ;;  %vm400_vm3 = vcmask 130048   ;;  %s511_s23 = sshll.u32 %s240_s11, 4  ;;  %s928_s14 = scalar_lea.hbm %s976_s5, %s605_s10  ;;  %s930_s23 = int_to_ptr.vmem [resolvable:$true] %s511_s23 }
  0x3b   : > { %v287_v11 = vand.u32 %v592_v6, %v282_v3  ;;  %v293_v12 = vand.u32 %v594_v7, %v282_v3  ;;  %v284_v13 = vand.u32 %v591_v8, %v282_v3  ;;  %397 = vperm.xlu1 %655, %v394_v17   ;;  %v393_v48 = vld [vmem:[%s974_s3] sm:$0x3]  ;;  %s497_s22 = scalar_lea.sflag [#allocation4], %s897_s13  ;;  %s691_s17 = scalar_lea.vmem %s930_s23, 256 }
  0x3c   : > { %v290_v14 = vand.u32 %v593_v9, %v282_v3  ;;  %p692_p6 = scmp.ne.s32.totalorder %s930_s23, %s691_s17  ;;  %p985_p10 = scmp.ne.s32.totalorder %s980_s30, 0 }
  0x3d   : > { %295 = vmatprep.subr.bf16.mxu0 %v287_v11  ;;  %338 = vmatprep.subr.bf16.mxu1 %v293_v12  ;;  %s762_s29 = smov [#allocation5]  }
  0x3e   : > { %296 = vmatpush1.bf16.msra.mxu0 %v284_v13  ;;  %339 = vmatpush1.bf16.msra.mxu1 %v290_v14  ;;  %p693_p11 = pnand %p692_p6, %p985_p10  ;;  %s695_s16 = sshll.u32 %s762_s29, 4  ;;  %s696_s16 = int_to_ptr.vmem [resolvable:$false] %s695_s16 }
  0x3f   : > { %257 = vperm.xlu0 %654, %v249_v15   ;;  %s697_s25 = scalar_lea.vmem %s696_s16, 512  ;;  %p698_p4 = scmp.lt.s32.totalorder %s930_s23, %s696_s16 }
  0x40   : > { %p694_p12 = pneg %p693_p11  ;;  %p699_p9 = scmp.lt.s32.totalorder %s697_s25, %s691_s17 }
  0x41   : > { %595 = vmatmul.mubr.msk.bf16.vlgmr.msra.gmra.mrb[0].mxu0 %vm275_vm2, %v660_v16  ;;  %596 = vmatmul.mubr.msk.bf16.vlgmr.msra.gmra.mrb[0].mxu1 %vm275_vm2, %v660_v16 }
  0x42   : > { %436 = vmatprep.mubr.bf16.mxu0 %v760_v0  ;;  %477 = vmatprep.mubr.bf16.mxu1 %v760_v0  ;;  %p700_p1 = por %p699_p9, %p698_p4 }
  0x44   : > { %p701_p3 = pnand %p700_p1, %p694_p12 }
  0xb9   : > { %v253_v18 = vpop.permute.xlu0 %252 }
  0xba   : > { %v398_v49 = vpop.permute.xlu1 %397 }
  0xbe   : > { %v258_v19 = vpop.permute.xlu0 %257 }
 0x114   : > { %v329_v20 = vpop.f32.mrb[0].mxu0  ;;  %v372_v21 = vpop.f32.mrb[0].mxu1 }
 0x115   : > { %v330_v22 = vadd.f32 %v329_v20, %v253_v18  ;;  %v373_v23 = vadd.f32 %v372_v21, %v253_v18  ;;  %v331_v24 = vpop.f32.mrb[1].mxu0  ;;  %v374_v25 = vpop.f32.mrb[1].mxu1 }
 0x116   : > { %v332_v26 = vadd.f32 %v331_v24, %v253_v18  ;;  %v375_v27 = vadd.f32 %v374_v25, %v253_v18  ;;  %v333_v28 = vpop.f32.mrb[2].mxu0  ;;  %v376_v29 = vpop.f32.mrb[2].mxu1 }
 0x117   : > { %v334_v30 = vadd.f32 %v333_v28, %v258_v19  ;;  %v377_v31 = vadd.f32 %v376_v29, %v258_v19  ;;  %v335_v32 = vpop.f32.mrb[3].mxu0  ;;  %v378_v33 = vpop.f32.mrb[3].mxu1  ;;  %v381_v36 = vmax.f32 %v330_v22, 0.0  ;;  %v383_v37 = vmax.f32 %v373_v23, 0.0 }
 0x118   : > { %v336_v34 = vadd.f32 %v335_v32, %v258_v19  ;;  %v379_v35 = vadd.f32 %v378_v33, %v258_v19  ;;  %v382_v40 = vmax.f32 %v332_v26, 0.0  ;;  %v384_v41 = vmax.f32 %v375_v27, 0.0 }
 0x119   : > { %v385_v38 = vmax.f32 %v334_v30, 0.0  ;;  %v387_v39 = vmax.f32 %v377_v31, 0.0 }
 0x11a   : > { %v386_v42 = vmax.f32 %v336_v34, 0.0  ;;  %v388_v43 = vmax.f32 %v379_v35, 0.0 }
 0x11b   : > { %v389_v44 = vpack.c.bf16 %v385_v38, %v381_v36  ;;  %v391_v45 = vpack.c.bf16 %v387_v39, %v383_v37 }
 0x11c   : > { %v390_v46 = vpack.c.bf16 %v386_v42, %v382_v40  ;;  %v392_v47 = vpack.c.bf16 %v388_v43, %v384_v41 }
 0x11e   : > { %404 = vmatprep.subr.bf16.mxu0 %v390_v46  ;;  %445 = vmatprep.subr.bf16.mxu1 %v392_v47 }
 0x11f   : > { %405 = vmatpush1.bf16.msra.mxu0 %v389_v44  ;;  %446 = vmatpush1.bf16.msra.mxu1 %v391_v45 }
 0x122   : > { %597 = vmatmul.mubr.msk.bf16.vlgmr.msra.gmra.mrb[4].mxu0 %vm400_vm3, %v393_v48  ;;  %598 = vmatmul.mubr.msk.bf16.vlgmr.msra.gmra.mrb[4].mxu1 %vm400_vm3, %v393_v48 }
 0x1f5   : > { %v438_v50 = vpop.f32.mrb[4].mxu0  ;;  %v479_v51 = vpop.f32.mrb[4].mxu1 }
 0x1f6   : > { %v440_v52 = vpop.f32.mrb[5].mxu0  ;;  %v481_v53 = vpop.f32.mrb[5].mxu1  ;;  %v439_v54 = vadd.f32 %v438_v50, %v398_v49  ;;  %v480_v55 = vadd.f32 %v479_v51, %v398_v49 }
 0x1f7   : > { %v442_v56 = vpop.f32.mrb[6].mxu0  ;;  %v483_v57 = vpop.f32.mrb[6].mxu1  ;;  %v441_v58 = vadd.f32 %v440_v52, %v398_v49  ;;  %v482_v59 = vadd.f32 %v481_v53, %v398_v49 }
 0x1f8   : > { %v443_v60 = vpop.f32.mrb[7].mxu0  ;;  %v484_v61 = vpop.f32.mrb[7].mxu1 }
 0x1f9   : > { %v490_v62 = vcombine.low %v439_v54, %v441_v58  ;;  %v491_v63 = vcombine.low %v480_v55, %v482_v59 }
 0x1fb   : > { %494 = vst [vmem:[%s240_s11] sm:$0x77] %v490_v62  ;;  %495 = vst [vmem:[%s240_s11 + $0x8] sm:$0x77] %v491_v63 }
 0x1fc   : > { %704 = shalt.err (!%p701_p3)
}
 0x1fd   : > { %s705_s13 = scalar_lea.hbm %s928_s14, 256  ;;  %s709_s8 = scalar_lea.hbm %s976_s5, 1024 }
 0x1fe   : > { %p706_p5 = scmp.ne.s32.totalorder %s928_s14, %s705_s13  ;;  %p710_p13 = scmp.lt.u32.totalorder %s928_s14, %s976_s5 }
 0x1ff   : > { %p711_p0 = scmp.lt.u32.totalorder %s709_s8, %s705_s13  ;;  %p713_p6 = scmp.lt.u32.totalorder %s705_s13, %s928_s14 }
 0x200   : > { %p707_p7 = pnand %p706_p5, %p985_p10 }
 0x201   : > { %p712_p2 = por %p711_p0, %p710_p13 }
 0x202   : > { %p708_p8 = pneg %p707_p7 }
 0x203   : > { %p714_p11 = por %p713_p6, %p712_p2 }
 0x205   : > { %p715_p12 = pnand %p714_p11, %p708_p8 }
 0x207   : > { %718 = shalt.err (!%p715_p12)
}
 0x208   : > { %608 = dma.vmem_to_hbm [thread:$0]  (%p985_p10), %s930_s23, 256, %s928_s14, %s497_s22  }
 0x209 PF: > { %p619_p4 = scmp.ge.s32.totalorder %s757_s21, 2  ;;  %s523_s10 = sand.u32 1, %s745_s18  }
 0x20a   : > { %p986_p9 = scmp.ne.s32.totalorder %s981_s6, 0  ;;  %s524_s11 = scalar_lea.sflag [#allocation4], %s523_s10 }
 0x20c   : > { %p615_p1 = pnand %p619_p4, %p986_p9 }
 0x20e   : > { %740 = dma.done.wait (!%p615_p1), %s524_s11, 256  }
 0x20f   : > { %742 = vsyncadd (!%p615_p1), %s524_s11, 4294967040  ;;  %p18_p3 = scmp.ge.s32.totalorder %s818_s24, 6   ;;  %s987_s18 = smov %s749_s19 }
 0x210   : > { %s988_s19 = smov %s753_s20  ;;  %s989_s20 = smov %s830_s27 }
 0x211   : > { %s990_s21 = smov %s818_s24  ;;  %20 = sbr.rel (!%p18_p3) target bundleno = 5 (0x5), region = 85 }
 0x218   :  { %529 = vsyncpa [#allocation3], 1 }
 0x219   :  { %531 = vsyncpa [#allocation3 + $0x1], 1 }
 0x21a   :  { %532 = vsyncpa [#allocation4], 1 }
 0x21b   :  { %534 = vsyncpa [#allocation4 + $0x1], 1 }

</bundles_post_ra>
